<compile_context>
chip_gen: v7x
topology: tpu7x:2x2x1
jax: 0.10.0
libtpu: 0.0.40
codegen_flags: <defaults>
</compile_context>

<pallas_src>
import functools

import numpy as np

import jax
import jax.numpy as jnp
from jax.experimental import pallas as pl

_LANES = 128  # TPU vreg lane width: pad streams to a multiple of this.


def _accumulate_kernel(x_ref, w_ref, avg_ref, tw_ref, new_avg_ref, new_tw_ref):
    x = x_ref[...]           # (1, Npad) observations (zero padded)
    w = w_ref[...]           # (1, Npad) weightings (0 on padding -> no contribution)
    avg0 = avg_ref[...]      # (1, 1) running average (0.0 before first update)
    tw0 = tw_ref[...]        # (1, 1) total weight accumulated so far

    sum_w = jnp.sum(w, axis=-1, keepdims=True)          # (1, 1)  XLU lane reduce
    sum_wx = jnp.sum(w * x, axis=-1, keepdims=True)     # (1, 1)

    new_tw = tw0 + sum_w
    new_tw_ref[...] = new_tw
    # avg is always weighted_sum / total_weight, so N sequential updates fold
    # into a single divide.
    new_avg_ref[...] = (tw0 * avg0 + sum_wx) / new_tw


@functools.partial(jax.jit, donate_argnums=(2, 3))
def _accumulate(x2, w2, avg, tw):
    """Single fused dispatch: Pallas state update, state aliased in place."""
    n = x2.shape[1]
    state_spec = pl.BlockSpec((1, 1), lambda: (0, 0))
    batch_spec = pl.BlockSpec((1, n), lambda: (0, 0))
    return pl.pallas_call(
        _accumulate_kernel,
        out_shape=(jax.ShapeDtypeStruct((1, 1), jnp.float32),   # new avg
                   jax.ShapeDtypeStruct((1, 1), jnp.float32)),  # new total_weight
        in_specs=[batch_spec, batch_spec, state_spec, state_spec],
        out_specs=(state_spec, state_spec),
        input_output_aliases={2: 0, 3: 1},   # avg -> new_avg, tw -> new_tw (in-place)
    )(x2, w2, avg, tw)


class Accumulator:
    """JAX/Pallas port of mlogger Accumulator_ (running weighted average)."""
    # TODO(synk): the visdom/mlogger `channel.update(time, value)` logging
    # side-effect has no Pallas equivalent and is omitted.

    def __init__(self):
        self.reset()

    def reset(self):
        # Mirrors torch: _avg is conceptually None until the first update; the
        # device buffer starts at 0.0 (matching `if self._avg is None: self._avg = 0`).
        self._has_update = False
        self._avg = jnp.zeros((1, 1), jnp.float32)
        self._total_weight = jnp.zeros((1, 1), jnp.float32)
        return self

    def update(self, values, weightings=1.0):
        """Fold one value or a whole stream of values into the running average."""
        # Host-side staging mirrors the original `.item()` semantics (the torch
        # module pulls the value to the host anyway) and lets us bucket/pad the
        # stream so the Pallas kernel sees lane-aligned, fixed-shape blocks.
        x = np.asarray(values, dtype=np.float32).reshape(-1)
        n = x.size
        if n == 0:
            return self
        w = np.broadcast_to(
            np.asarray(weightings, dtype=np.float32), (n,)).astype(np.float32)
        assert np.all(w > 0), "weightings must be > 0"

        n_pad = ((n + _LANES - 1) // _LANES) * _LANES
        x_pad = np.zeros((1, n_pad), np.float32)
        w_pad = np.zeros((1, n_pad), np.float32)   # zero weight => no contribution
        x_pad[0, :n] = x
        w_pad[0, :n] = w

        self._avg, self._total_weight = _accumulate(
            x_pad, w_pad, self._avg, self._total_weight)
        self._has_update = True
        return self

    def forward(self, x, weighting=1.0):
        # Original contract: x holds exactly one element (`.item()`).
        assert np.asarray(x).size == 1
        self.update(x, weighting)
        return x  # true identity pass-through: same object, same dtype

    __call__ = forward

    @property
    def state(self):
        return self._avg, self._total_weight

    @property
    def value_avg(self):
        if not self._has_update:
            return None  # mirrors the torch module's `_avg is None` state
        return float(self._avg[0, 0])

    @property
    def total_weight(self):
        return float(self._total_weight[0, 0])


if __name__ == "__main__":
    key = jax.random.PRNGKey(0)
    vals = jax.random.normal(key, (8,), dtype=jnp.float32)   # stream of scalar observations
    weights = [1.0 + 0.5 * i for i in range(8)]              # exercise non-unit weightings

    acc = Accumulator()

    # First half: per-call forward(), one single-element tensor at a time
    # (original module semantics: update + identity return).
    for i in range(4):
        x = vals[i].reshape(1)
        y = acc(x, weighting=weights[i])
        assert y is x, "forward must be an identity pass-through"

    # Second half: fold the whole remaining stream in with ONE pallas_call.
    acc.update(vals[4:], jnp.asarray(weights[4:], jnp.float32))

    jax.block_until_ready(acc.state)

    # Pure-Python iterative reference (float64), matching _update() exactly.
    ref_avg, ref_tw = 0.0, 0.0
    host_vals = np.asarray(vals, np.float64)
    for i in range(8):
        v, w = float(host_vals[i]), weights[i]
        r = ref_tw / (w + ref_tw)
        ref_avg = r * ref_avg + (1.0 - r) * v
        ref_tw += w

    assert abs(acc.value_avg - ref_avg) < 1e-5, (acc.value_avg, ref_avg)
    assert abs(acc.total_weight - ref_tw) < 1e-5, (acc.total_weight, ref_tw)

    print("KERNEL_OK")
</pallas_src>

<mosaic_0001>
module attributes {stable_mosaic.version = 11 : i64} {
  func.func @_accumulate_kernel(%arg0: memref<1x128xf32, #tpu.memory_space<vmem>>, %arg1: memref<1x128xf32, #tpu.memory_space<vmem>>, %arg2: memref<1x1xf32, #tpu.memory_space<vmem>>, %arg3: memref<1x1xf32, #tpu.memory_space<vmem>>, %arg4: memref<1x1xf32, #tpu.memory_space<vmem>>, %arg5: memref<1x1xf32, #tpu.memory_space<vmem>>) attributes {dimension_semantics = [], scalar_prefetch = 0 : i64, scratch_operands = 0 : i64, tpu.core_type = #tpu.core_type<tc>} {
    %c0 = arith.constant 0 : index
    %c0_0 = arith.constant 0 : index
    %0 = vector.load %arg0[%c0, %c0_0] : memref<1x128xf32, #tpu.memory_space<vmem>>, vector<1x128xf32>
    %c0_1 = arith.constant 0 : index
    %c0_2 = arith.constant 0 : index
    %1 = vector.load %arg1[%c0_1, %c0_2] : memref<1x128xf32, #tpu.memory_space<vmem>>, vector<1x128xf32>
    %c0_3 = arith.constant 0 : index
    %c0_4 = arith.constant 0 : index
    %2 = vector.load %arg2[%c0_3, %c0_4] : memref<1x1xf32, #tpu.memory_space<vmem>>, vector<1x1xf32>
    %c0_5 = arith.constant 0 : index
    %c0_6 = arith.constant 0 : index
    %3 = vector.load %arg3[%c0_5, %c0_6] : memref<1x1xf32, #tpu.memory_space<vmem>>, vector<1x1xf32>
    %cst = arith.constant dense<0.000000e+00> : vector<1xf32>
    %4 = vector.multi_reduction <add>, %1, %cst [1] : vector<1x128xf32> to vector<1xf32>
    %5 = vector.shape_cast %4 : vector<1xf32> to vector<1x1xf32>
    %6 = arith.mulf %1, %0 : vector<1x128xf32>
    %cst_7 = arith.constant dense<0.000000e+00> : vector<1xf32>
    %7 = vector.multi_reduction <add>, %6, %cst_7 [1] : vector<1x128xf32> to vector<1xf32>
    %8 = vector.shape_cast %7 : vector<1xf32> to vector<1x1xf32>
    %9 = arith.addf %3, %5 : vector<1x1xf32>
    %c0_8 = arith.constant 0 : index
    %c0_9 = arith.constant 0 : index
    %10 = vector.load %arg5[%c0_8, %c0_9] : memref<1x1xf32, #tpu.memory_space<vmem>>, vector<1x1xf32>
    tpu.vector_store %arg5[%c0_8, %c0_9], %9 {strides = array<i32>} : memref<1x1xf32, #tpu.memory_space<vmem>>, vector<1x1xf32>,
    %11 = arith.mulf %3, %2 : vector<1x1xf32>
    %12 = arith.addf %11, %8 : vector<1x1xf32>
    %13 = arith.divf %12, %9 : vector<1x1xf32>
    %c0_10 = arith.constant 0 : index
    %c0_11 = arith.constant 0 : index
    %14 = vector.load %arg4[%c0_10, %c0_11] : memref<1x1xf32, #tpu.memory_space<vmem>>, vector<1x1xf32>
    tpu.vector_store %arg4[%c0_10, %c0_11], %13 {strides = array<i32>} : memref<1x1xf32, #tpu.memory_space<vmem>>, vector<1x1xf32>,
    return
  }
}

</mosaic_0001>

<bundles_post_ra>
// kernel: _accumulate.1
= control target key start
LH: loop header
LB: loop body
LE: loop exit
PB: predicated region body
PF: predicated region fallthrough
CT: control target
= control target key end

     0   :  { %s195_s0 = inlined_call_operand.vmem [shape: f32[1,128], index: 0, kind: input, shape index: {}]   ;;  %s196_s1 = inlined_call_operand.vmem [shape: f32[1,128], index: 1, kind: input, shape index: {}]   ;;  %s197_s2 = inlined_call_operand.<no memory space> [shape: f32[1,1], index: 2, kind: input, shape index: {}, may-alias: {2,4}]   ;;  %s198_s4 = inlined_call_operand.hbm [shape: f32[1,1], index: 4, kind: output, shape index: {0}, may-alias: {2,4}]   ;;  %s199_s5 = inlined_call_operand.hbm [shape: f32[1,1], index: 5, kind: output, shape index: {1}, may-alias: {3,5}]   ;;  %s200_s3 = inlined_call_operand.<no memory space> [shape: f32[1,1], index: 3, kind: input, shape index: {}, may-alias: {3,5}]  }
   0x1   :  { %v11_v0 = vstv %s197_s2  ;;  %v13_v1 = vstv %s200_s3 }
   0x2   :  { %12 = vst [vmem:[#allocation2] sm:$0x1] %v11_v0  ;;  %14 = vst [vmem:[#allocation3] sm:$0x1] %v13_v1 }
   0x3   :  { %15 = vsyncpa [#allocation5], 0  ;;  %v26_v2 = vld [vmem:[%s196_s1] sm:$0x1]  ;;  %vm29_vm0 = vcmask 1040384  }
   0x4   :  { %v25_v3 = vld [vmem:[%s195_s0] sm:$0x1]  ;;  %v30_v4 = vsel %vm29_vm0, %v26_v2, 0.0 }
   0x5   :  { %v33_v5 = vmul.f32 %v26_v2, %v25_v3 }
   0x6   :  { %16 = vsyncpa [#allocation7], 0  ;;  %31 = vadd.xlane.f32.xlu0 %v30_v4  ;;  %s125_s2 = smov [#allocation6]   ;;  %vm38_vm1 = vcmask 0  }
   0x7   :  { %v34_v6 = vsel %vm29_vm0, %v33_v5, 0.0  ;;  %s61_s3 = sshll.u32 %s125_s2, 4  ;;  %s62_s3 = int_to_ptr.vmem [resolvable:$true] %s61_s3 }
   0x8   :  { %s77_s1 = scalar_lea.vmem %s62_s3, 16  ;;  %s81_s0 = scalar_lea.vmem %s62_s3, 32 }
   0x9   :  { %v28_v7 = vld [vmem:[#allocation3] sm:$0x1]  ;;  %v27_v10 = vld [vmem:[#allocation2] sm:$0x1]  ;;  %p78_p0 = scmp.ne.s32.totalorder %s62_s3, %s77_s1  ;;  %p82_p1 = scmp.lt.s32.totalorder %s62_s3, %s62_s3 }
   0xa   :  { %35 = vadd.xlane.f32.xlu0 %v34_v6  ;;  %p83_p2 = scmp.lt.s32.totalorder %s81_s0, %s77_s1 }
   0xc   :  { %p84_p3 = por %p83_p2, %p82_p1 }
   0xe   :  { %p85_p4 = pnand %p84_p3, %p78_p0 }
  0x93   :  { %v32_v8 = vpop.xlane.xlu0 %31 }
  0x94   :  { %v37_v9 = vadd.f32 %v32_v8, %v28_v7 }
  0x96   :  { %75 = vrcp.f32 %v37_v9  ;;  %39 = vst.msk [vmem:[#allocation6] sm:$0x1] %vm38_vm1, %v37_v9 }
  0x97   :  { %88 = shalt.err (!%p85_p4)
}
  0x98   :  { %s89_s28 = scalar_lea.hbm %s199_s5, 16 }
  0x99   :  { %p90_p5 = scmp.ne.s32.totalorder %s199_s5, %s89_s28  ;;  %p93_p6 = scmp.lt.u32.totalorder %s89_s28, %s199_s5 }
  0x9b   :  { %p95_p7 = pnand %p93_p6, %p90_p5 }
  0x9d   :  { %98 = shalt.err (!%p95_p7)
}
  0x9e   :  { %64 = dma.vmem_to_hbm [thread:$0]  %s62_s3, 16, %s199_s5, [#allocation7]   ;;  %v40_v11 = vmul.f32 %v28_v7, %v27_v10  ;;  %v36_v12 = vpop.xlane.xlu0 %35 }
  0x9f   :  { %s126_s10 = smov [#allocation4]  }
  0xa0   :  { %v41_v13 = vadd.f32 %v40_v11, %v36_v12  ;;  %s51_s11 = sshll.u32 %s126_s10, 4  ;;  %v76_v14 = vpop.eup %75  ;;  %s52_s11 = int_to_ptr.vmem [resolvable:$true] %s51_s11 }
  0xa1   :  { %s99_s12 = scalar_lea.vmem %s52_s11, 16  ;;  %s103_s13 = scalar_lea.vmem %s52_s11, 32 }
  0xa2   :  { %v43_v15 = vmul.f32 %v76_v14, %v41_v13  ;;  %p100_p8 = scmp.ne.s32.totalorder %s52_s11, %s99_s12  ;;  %p104_p9 = scmp.lt.s32.totalorder %s52_s11, %s52_s11 }
  0xa3   :  { %p105_p10 = scmp.lt.s32.totalorder %s103_s13, %s99_s12 }
  0xa4   :  { %44 = vst.msk [vmem:[#allocation4] sm:$0x1] %vm38_vm1, %v43_v15 }
  0xa5   :  { %p106_p11 = por %p105_p10, %p104_p9 }
  0xa7   :  { %p107_p12 = pnand %p106_p11, %p100_p8 }
  0xa9   :  { %110 = shalt.err (!%p107_p12)
}
  0xaa   :  { %s111_s15 = scalar_lea.hbm %s198_s4, 16 }
  0xab   :  { %p112_p13 = scmp.ne.s32.totalorder %s198_s4, %s111_s15  ;;  %p115_p0 = scmp.lt.u32.totalorder %s111_s15, %s198_s4 }
  0xad   :  { %p117_p1 = pnand %p115_p0, %p112_p13 }
  0xaf   :  { %120 = shalt.err (!%p117_p1)
}
  0xb0   :  { %54 = dma.vmem_to_hbm [thread:$0]  %s52_s11, 16, %s198_s4, [#allocation5]  }
  0xb1   :  { %121 = dma.done.wait [#allocation5], 16  }
  0xb2   :  { %122 = vsyncadd [#allocation5], 4294967280 }
  0xb3   :  { %123 = dma.done.wait [#allocation7], 16  }
  0xb4   :  { %124 = vsyncadd [#allocation7], 4294967280 }
  0xb5   :  { %71 = vsyncpa [#allocation5], 1 }
  0xb6   :  { %72 = vsyncpa [#allocation7], 1 }

</bundles_post_ra>
